<compile_context>
chip_gen: v7x
topology: tpu7x:2x2x1
jax: 0.10.0
libtpu: 0.0.40
codegen_flags: <defaults>
</compile_context>

<pallas_src>
import functools

import jax
import jax.numpy as jnp
from jax.experimental import pallas as pl
from jax.experimental.pallas import tpu as pltpu


def _fused_residual_block(x, s0, s2, w3_ref, wp_ref, b_ref, out_dtype):
    """Dilated 3-tap conv (one MXU matmul) -> ReLU -> 1x1 conv -> residual add."""
    s_all = jnp.concatenate([s0, x, s2], axis=0)              # (3C, Tt) stacked taps
    h = jnp.dot(w3_ref[...], s_all, preferred_element_type=jnp.float32)
    h = jnp.maximum(h + b_ref[:, 0:1], 0.0)                   # ReLU(conv_dilated(x))
    out = jnp.dot(wp_ref[...], h, preferred_element_type=jnp.float32) + b_ref[:, 1:2]
    # TODO(synk): nn.Dropout is identity at inference; training-mode dropout not implemented.
    return (x.astype(jnp.float32) + out).astype(out_dtype)


def _drl_single_tile_kernel(x_ref, w3_ref, wp_ref, b_ref, o_ref, *, dilation):
    """Whole sequence resident in VMEM; +/-d taps via pltpu.roll + boundary mask."""
    x = x_ref[0]                                              # (C, T)
    T = x.shape[-1]
    d = dilation
    if d >= T:                     # degenerate: every tap lands in the zero padding
        s0 = jnp.zeros_like(x)
        s2 = jnp.zeros_like(x)
    else:
        t = jax.lax.broadcasted_iota(jnp.int32, (1, T), 1)
        s0 = jnp.where(t >= d, pltpu.roll(x, d, axis=1), 0.0)          # x[t - d]
        s2 = jnp.where(t < T - d, pltpu.roll(x, T - d, axis=1), 0.0)   # x[t + d]
    o_ref[0] = _fused_residual_block(x, s0, s2, w3_ref, wp_ref, b_ref, o_ref.dtype)


def _drl_tiled_kernel(x_ref, lh_ref, rh_ref, w3_ref, wp_ref, b_ref, o_ref, *,
                      dilation, seq_len):
    """T-tiled path: main tile plus small lane-aligned halo windows of the same array."""
    x = x_ref[0]                                              # (C, Tt)
    lh = lh_ref[0]                                            # (C, Hb): [tile_start - Hb, tile_start)
    rh = rh_ref[0]                                            # (C, Hb): [tile_end, tile_end + Hb)
    t_tile = x.shape[-1]
    halo = lh.shape[-1]
    d = dilation
    # Lane-aligned concat (all pieces are multiples of 128 lanes); static shifted
    # slices of the extended window give the +/-d taps.
    ext = jnp.concatenate([lh, x, rh], axis=1)                # (C, Hb + Tt + Hb)
    s0 = ext[:, halo - d:halo - d + t_tile]                   # x[t - d]
    s2 = ext[:, halo + d:halo + d + t_tile]                   # x[t + d]
    # Zero taps that fall outside [0, seq_len): conv zero padding, clamped
    # boundary halos and the ragged tail of the last tile.
    col = pl.program_id(1) * t_tile + jax.lax.broadcasted_iota(
        jnp.int32, (1, t_tile), 1)
    s0 = jnp.where(col >= d, s0, 0.0)
    s2 = jnp.where(col + d < seq_len, s2, 0.0)
    o_ref[0] = _fused_residual_block(x, s0, s2, w3_ref, wp_ref, b_ref, o_ref.dtype)


def dilated_residual_layer(x, mask, w_dil, b_dil, w_1x1, b_1x1, *, dilation,
                           t_tile=2048):
    """x: (N, C, T); mask accepted but unused (matches the PyTorch forward).

    Parameters follow PyTorch Conv1d conventions:
      w_dil: (C, C, 3), b_dil: (C,), w_1x1: (C, C, 1), b_1x1: (C,).
    For best store throughput keep T a multiple of 128 (lane-dense output);
    the kernel is correct for any T (ragged tail is masked).
    """
    del mask  # forward() returns x + out; the mask is never applied in the reference.
    N, C, T = x.shape
    O, Ci, K = w_dil.shape
    assert K == 3 and Ci == C and O == C, "residual layer requires C_in == C_out, k=3"
    assert dilation >= 1

    # Pack parameters into three small, grid-invariant inputs.
    w3 = jnp.concatenate([w_dil[:, :, 0], w_dil[:, :, 1], w_dil[:, :, 2]], axis=1)  # (C, 3C)
    wp = w_1x1[:, :, 0]                                       # (C, C)
    bpack = jnp.stack([b_dil, b_1x1], axis=1)                 # (C, 2)

    use_single = T <= t_tile
    if not use_single:
        halo = ((dilation + 127) // 128) * 128                # >= dilation, multiple of 128
        tt = max(halo, (t_tile // halo) * halo)               # multiple of halo (and of 128)
        if T <= tt:
            use_single = True

    if use_single:
        # One block per sample: x streamed once, halo handled in-register.
        kernel = functools.partial(_drl_single_tile_kernel, dilation=dilation)
        grid = (N,)
        in_specs = [
            pl.BlockSpec((1, C, T), lambda n: (n, 0, 0)),     # x, streamed once
            pl.BlockSpec((C, 3 * C), lambda n: (0, 0)),       # fused tap weights
            pl.BlockSpec((C, C), lambda n: (0, 0)),           # 1x1 weights
            pl.BlockSpec((C, 2), lambda n: (0, 0)),           # packed biases
        ]
        out_specs = pl.BlockSpec((1, C, T), lambda n: (n, 0, 0))
        dims = ("parallel",)
        operands = (x, w3, wp, bpack)
    else:
        r = tt // halo
        n_t = -(-T // tt)                                     # ceil-div; ragged tail OK
        last_halo_blk = -(-T // halo) - 1
        kernel = functools.partial(_drl_tiled_kernel, dilation=dilation, seq_len=T)
        grid = (N, n_t)
        in_specs = [
            pl.BlockSpec((1, C, tt), lambda n, j: (n, 0, j)),  # main tile
            pl.BlockSpec((1, C, halo),                         # left halo (clamped at j==0)
                         lambda n, j: (n, 0, jnp.maximum(j * r - 1, 0))),
            pl.BlockSpec((1, C, halo),                         # right halo (clamped at the end)
                         lambda n, j: (n, 0, jnp.minimum((j + 1) * r, last_halo_blk))),
            pl.BlockSpec((C, 3 * C), lambda n, j: (0, 0)),
            pl.BlockSpec((C, C), lambda n, j: (0, 0)),
            pl.BlockSpec((C, 2), lambda n, j: (0, 0)),
        ]
        out_specs = pl.BlockSpec((1, C, tt), lambda n, j: (n, 0, j))
        dims = ("parallel", "parallel")                        # megacore may split N and T
        operands = (x, x, x, w3, wp, bpack)

    return pl.pallas_call(
        kernel,
        out_shape=jax.ShapeDtypeStruct((N, C, T), x.dtype),
        grid=grid,
        in_specs=in_specs,
        out_specs=out_specs,
        compiler_params=pltpu.CompilerParams(dimension_semantics=dims),
    )(*operands)


def _reference(x, w_dil, b_dil, w_1x1, b_1x1, dilation):
    """Pure-JAX reference using lax.conv_general_dilated (NCT layout)."""
    dn = jax.lax.conv_dimension_numbers(x.shape, w_dil.shape, ("NCH", "OIH", "NCH"))
    h = jax.lax.conv_general_dilated(
        x, w_dil, window_strides=(1,), padding=[(dilation, dilation)],
        rhs_dilation=(dilation,), dimension_numbers=dn)
    h = jax.nn.relu(h + b_dil[None, :, None])
    out = jax.lax.conv_general_dilated(
        h, w_1x1, window_strides=(1,), padding=[(0, 0)], dimension_numbers=dn)
    return x + out + b_1x1[None, :, None]


if __name__ == "__main__":
    key = jax.random.PRNGKey(0)
    kx, kw0, kb0, kw1, kb1, kx2 = jax.random.split(key, 6)

    # Primary small example (single-tile path). T=128 keeps the output lane-dense.
    N, C, T, dilation = 2, 8, 128, 2
    x = jax.random.normal(kx, (N, C, T), dtype=jnp.float32)
    mask = jnp.ones((N, 1, T), dtype=jnp.float32)             # unused by forward()
    w_dil = jax.random.normal(kw0, (C, C, 3), dtype=jnp.float32) * 0.2
    b_dil = jax.random.normal(kb0, (C,), dtype=jnp.float32) * 0.1
    w_1x1 = jax.random.normal(kw1, (C, C, 1), dtype=jnp.float32) * 0.2
    b_1x1 = jax.random.normal(kb1, (C,), dtype=jnp.float32) * 0.1

    y = dilated_residual_layer(x, mask, w_dil, b_dil, w_1x1, b_1x1, dilation=dilation)
    jax.block_until_ready(y)
    y_ref = _reference(x, w_dil, b_dil, w_1x1, b_1x1, dilation)
    assert y.shape == (N, C, T)
    assert jnp.allclose(y, y_ref, atol=1e-4, rtol=1e-4), "single-tile path mismatch"

    # Secondary check: exercise the T-tiled path (halo blocks + ragged tail) with
    # a small forced tile size.
    N2, T2, d2 = 1, 400, 4
    x2 = jax.random.normal(kx2, (N2, C, T2), dtype=jnp.float32)
    mask2 = jnp.ones((N2, 1, T2), dtype=jnp.float32)
    y2 = dilated_residual_layer(x2, mask2, w_dil, b_dil, w_1x1, b_1x1,
                                dilation=d2, t_tile=128)
    jax.block_until_ready(y2)
    y2_ref = _reference(x2, w_dil, b_dil, w_1x1, b_1x1, d2)
    assert jnp.allclose(y2, y2_ref, atol=1e-4, rtol=1e-4), "tiled path mismatch"

    print("KERNEL_OK")
</pallas_src>

<mosaic_0001>
module attributes {stable_mosaic.version = 11 : i64} {
  func.func @_drl_single_tile_kernel(%arg0: i32, %arg1: memref<1x8x128xf32, #tpu.memory_space<vmem>>, %arg2: memref<8x24xf32, #tpu.memory_space<vmem>>, %arg3: memref<8x8xf32, #tpu.memory_space<vmem>>, %arg4: memref<8x2xf32, #tpu.memory_space<vmem>>, %arg5: memref<1x8x128xf32, #tpu.memory_space<vmem>>) attributes {dimension_semantics = [#tpu.dimension_semantics<parallel>], iteration_bounds = array<i64: 2>, scalar_prefetch = 0 : i64, scratch_operands = 0 : i64, tpu.core_type = #tpu.core_type<tc>, window_params = [{transform_indices = @transform_0, window_bounds = array<i64: 1, 8, 128>}, {pipeline_mode = #tpu.pipeline_mode<synchronous>, transform_indices = @transform_1, window_bounds = array<i64: 8, 24>}, {pipeline_mode = #tpu.pipeline_mode<synchronous>, transform_indices = @transform_2, window_bounds = array<i64: 8, 8>}, {pipeline_mode = #tpu.pipeline_mode<synchronous>, transform_indices = @transform_3, window_bounds = array<i64: 8, 2>}, {transform_indices = @transform_4, window_bounds = array<i64: 1, 8, 128>}]} {
    %c0 = arith.constant 0 : index
    %c0_0 = arith.constant 0 : index
    %c0_1 = arith.constant 0 : index
    %0 = vector.load %arg1[%c0, %c0_0, %c0_1] : memref<1x8x128xf32, #tpu.memory_space<vmem>>, vector<1x8x128xf32>
    %1 = vector.shape_cast %0 : vector<1x8x128xf32> to vector<8x128xf32>
    %2 = tpu.iota {dimensions = array<i32: 1>} : vector<1x128xi32>
    %c2_i32 = arith.constant 2 : i32
    %3 = vector.broadcast %c2_i32 : i32 to vector<1x128xi32>
    %4 = arith.cmpi sge, %2, %3 : vector<1x128xi32>
    %c2_i32_2 = arith.constant 2 : i32
    %5 = tpu.dynamic_rotate %1 by %c2_i32_2 dim 1 : vector<8x128xf32>, i32 -> vector<8x128xf32>
    %cst = arith.constant 0.000000e+00 : f32
    %6 = vector.shape_cast %4 : vector<1x128xi1> to vector<1x128xi1>
    %7 = vector.broadcast %6 : vector<1x128xi1> to vector<8x128xi1>
    %8 = vector.broadcast %cst : f32 to vector<8x128xf32>
    %9 = arith.select %7, %5, %8 : vector<8x128xi1>, vector<8x128xf32>
    %c126_i32 = arith.constant 126 : i32
    %10 = vector.broadcast %c126_i32 : i32 to vector<1x128xi32>
    %11 = arith.cmpi slt, %2, %10 : vector<1x128xi32>
    %c126_i32_3 = arith.constant 126 : i32
    %12 = tpu.dynamic_rotate %1 by %c126_i32_3 dim 1 : vector<8x128xf32>, i32 -> vector<8x128xf32>
    %cst_4 = arith.constant 0.000000e+00 : f32
    %13 = vector.shape_cast %11 : vector<1x128xi1> to vector<1x128xi1>
    %14 = vector.broadcast %13 : vector<1x128xi1> to vector<8x128xi1>
    %15 = vector.broadcast %cst_4 : f32 to vector<8x128xf32>
    %16 = arith.select %14, %12, %15 : vector<8x128xi1>, vector<8x128xf32>
    %17 = tpu.concatenate %9, %1, %16 in 0 : vector<8x128xf32>, vector<8x128xf32>, vector<8x128xf32> -> vector<24x128xf32>
    %c0_5 = arith.constant 0 : index
    %c0_6 = arith.constant 0 : index
    %18 = vector.load %arg2[%c0_5, %c0_6] : memref<8x24xf32, #tpu.memory_space<vmem>>, vector<8x24xf32>
    %cst_7 = arith.constant dense<0.000000e+00> : vector<8x128xf32>
    %19 = tpu.matmul %18, %17, %cst_7 {dimension_numbers = #tpu.dot_dimension_numbers<[1], [0], [0], [1], [0, 0, 1, 1], [], []>} : vector<8x24xf32>, vector<24x128xf32>, vector<8x128xf32> -> vector<8x128xf32>
    %c0_8 = arith.constant 0 : index
    %c0_9 = arith.constant 0 : index
    %20 = vector.load %arg4[%c0_8, %c0_9] : memref<8x2xf32, #tpu.memory_space<vmem>>, vector<8x1xf32>
    %21 = vector.broadcast %20 : vector<8x1xf32> to vector<8x128xf32>
    %22 = arith.addf %19, %21 : vector<8x128xf32>
    %cst_10 = arith.constant 0.000000e+00 : f32
    %23 = vector.broadcast %cst_10 : f32 to vector<8x128xf32>
    %24 = arith.maximumf %22, %23 : vector<8x128xf32>
    %c0_11 = arith.constant 0 : index
    %c0_12 = arith.constant 0 : index
    %25 = vector.load %arg3[%c0_11, %c0_12] : memref<8x8xf32, #tpu.memory_space<vmem>>, vector<8x8xf32>
    %cst_13 = arith.constant dense<0.000000e+00> : vector<8x128xf32>
    %26 = tpu.matmul %25, %24, %cst_13 {dimension_numbers = #tpu.dot_dimension_numbers<[1], [0], [0], [1], [0, 0, 1, 1], [], []>} : vector<8x8xf32>, vector<8x128xf32>, vector<8x128xf32> -> vector<8x128xf32>
    %c0_14 = arith.constant 0 : index
    %c1 = arith.constant 1 : index
    %27 = vector.load %arg4[%c0_14, %c1] : memref<8x2xf32, #tpu.memory_space<vmem>>, vector<8x1xf32>
    %28 = vector.broadcast %27 : vector<8x1xf32> to vector<8x128xf32>
    %29 = arith.addf %26, %28 : vector<8x128xf32>
    %30 = arith.addf %1, %29 : vector<8x128xf32>
    %c0_15 = arith.constant 0 : index
    %c0_16 = arith.constant 0 : index
    %c0_17 = arith.constant 0 : index
    %31 = vector.load %arg5[%c0_15, %c0_16, %c0_17] : memref<1x8x128xf32, #tpu.memory_space<vmem>>, vector<1x8x128xf32>
    %32 = vector.shape_cast %31 : vector<1x8x128xf32> to vector<8x128xf32>
    %33 = vector.shape_cast %30 : vector<8x128xf32> to vector<1x8x128xf32>
    tpu.vector_store %arg5[%c0_15, %c0_16, %c0_17], %33 {strides = array<i32>} : memref<1x8x128xf32, #tpu.memory_space<vmem>>, vector<1x8x128xf32>,
    return
  }
  func.func @transform_0(%arg0: i32) -> (i32, i32, i32) {
    %c0_i32 = arith.constant 0 : i32
    %c0_i32_0 = arith.constant 0 : i32
    %c0_i32_1 = arith.constant 0 : i32
    return %arg0, %c0_i32, %c0_i32_0 : i32, i32, i32
  }
  func.func @transform_1(%arg0: i32) -> (i32, i32) {
    %c0_i32 = arith.constant 0 : i32
    %c0_i32_0 = arith.constant 0 : i32
    %c0_i32_1 = arith.constant 0 : i32
    return %c0_i32, %c0_i32_0 : i32, i32
  }
  func.func @transform_2(%arg0: i32) -> (i32, i32) {
    %c0_i32 = arith.constant 0 : i32
    %c0_i32_0 = arith.constant 0 : i32
    %c0_i32_1 = arith.constant 0 : i32
    return %c0_i32, %c0_i32_0 : i32, i32
  }
  func.func @transform_3(%arg0: i32) -> (i32, i32) {
    %c0_i32 = arith.constant 0 : i32
    %c0_i32_0 = arith.constant 0 : i32
    %c0_i32_1 = arith.constant 0 : i32
    return %c0_i32, %c0_i32_0 : i32, i32
  }
  func.func @transform_4(%arg0: i32) -> (i32, i32, i32) {
    %c0_i32 = arith.constant 0 : i32
    %c0_i32_0 = arith.constant 0 : i32
    %c0_i32_1 = arith.constant 0 : i32
    return %arg0, %c0_i32, %c0_i32_0 : i32, i32, i32
  }
}

</mosaic_0001>

<bundles_post_ra>
// kernel: tpu_custom_call.1
= control target key start
LH: loop header
LB: loop body
LE: loop exit
PB: predicated region body
PF: predicated region fallthrough
CT: control target
= control target key end

     0   :  { %9 = vsyncpa [#allocation3], 0  ;;  %s879_s0 = inlined_call_operand.hbm [shape: f32[2,8,128], index: 0, kind: input, shape index: {}]   ;;  %s880_s1 = inlined_call_operand.vmem [shape: f32[8,24], index: 1, kind: input, shape index: {}]   ;;  %s881_s2 = inlined_call_operand.vmem [shape: f32[8,8], index: 2, kind: input, shape index: {}]   ;;  %s882_s3 = inlined_call_operand.vmem [shape: f32[8,2], index: 3, kind: input, shape index: {}]   ;;  %s883_s4 = inlined_call_operand.hbm [shape: f32[2,8,128], index: 4, kind: output, shape index: {}]  }
   0x1   :  { %11 = vsyncpa [#allocation3 + $0x1], 0 }
   0x2   :  { %12 = vsyncpa [#allocation4], 0 }
   0x3   :  { %14 = vsyncpa [#allocation4 + $0x1], 0  ;;  %s705_s15 = smov 0   ;;  %s707_s16 = smov 0  }
   0x4   :  { %s709_s17 = smov 0   ;;  %s711_s18 = smov 0  }
   0x5 LB: > { %s726_s19 = sadd.s32 4294967295, %s668_s18   ;;  %s475_s20 = sadd.s32 4294967294, %s668_s18   ;;  %s668_s18 = sphi %s711_s18, %s898_s18   ;;  %s664_s17 = sphi %s709_s17, %s897_s17   ;;  %s660_s16 = sphi %s707_s16, %s896_s16   ;;  %s656_s15 = sphi %s705_s15, %s895_s15  }
   0x6   : > { %s730_s21 = sadd.s32 1, %s668_s18   ;;  %s27_s22 = sadd.s32 1, %s664_s17 }
   0x7   : > { %s24_s23 = ssub.s32 %s668_s18, %s730_s21  ;;  %p34_p0 = scmp.ne.s32.totalorder %s664_s17, %s660_s16 }
   0x8   : > { %p25_p1 = scmp.eq.s32.totalorder %s24_s23, 0  ;;  %p35_p2 = scmp.eq.s32.totalorder %s668_s18, 0 }
   0x9   : > { %p40_p3 = scmp.ne.s32.totalorder %s660_s16, %s656_s15  ;;  %p41_p4 = scmp.eq.s32.totalorder %s726_s19, 0 }
   0xa   : > { %s742_s24 = scalar_select %p25_p1, %s664_s17, %s27_s22  }
   0xb   : > { %p744_p5 = por %p35_p2, %p34_p0  ;;  %p748_p6 = por %p41_p4, %p40_p3 }
   0xc   : > { %p127_p7 = scmp.eq.s32.totalorder %s726_s19, 1  ;;  %p133_p8 = scmp.eq.s32.totalorder %s475_s20, 1 }
   0xd   : > { %p527_p10 = scmp.lt.s32.totalorder %s668_s18, 2  ;;  %s162_s29 = sand.u32 1, %s664_s17  }
   0xe   : > { %p755_p11 = por %p127_p7, %p34_p0  ;;  %p759_p12 = por %p133_p8, %p40_p3 }
   0xf   : > { %s479_s30 = sshll.u32 %s668_s18, 7  ;;  %s478_s5 = sshll.u32 %s162_s29, 3 }
  0x10   : > { %s887_s27 = scalar_select %p755_p11, 1, 0 }
  0x11   : > { %s888_s28 = scalar_select %p759_p12, 1, 0 }
  0x12   : > { %s768_s8 = scalar_lea.hbm %s879_s0, %s479_s30  ;;  %s166_s9 = scalar_lea.vmem [#allocation2], %s478_s5 }
  0x13   : > { %s173_s10 = sshll.u32 %s166_s9, 4  ;;  %p772_p13 = pnand %p527_p10, %p744_p5  ;;  %s776_s10 = int_to_ptr.vmem [resolvable:$true] %s173_s10 }
  0x14   : > { %s163_s12 = scalar_lea.sflag [#allocation3], %s162_s29  ;;  %s572_s13 = scalar_lea.hbm %s768_s8, 128 }
  0x15   : > { %p573_p2 = scmp.ne.s32.totalorder %s768_s8, %s572_s13  ;;  %p574_p3 = pneg %p772_p13 }
  0x16   : > { %s577_s22 = scalar_lea.hbm %s879_s0, 256  ;;  %p578_p5 = scmp.lt.u32.totalorder %s768_s8, %s879_s0 }
  0x17   : > { %p575_p4 = pnand %p574_p3, %p573_p2  ;;  %p579_p8 = scmp.lt.u32.totalorder %s577_s22, %s572_s13 }
  0x18   : > { %p581_p9 = scmp.lt.u32.totalorder %s572_s13, %s768_s8 }
  0x19   : > { %p576_p7 = pneg %p575_p4  ;;  %p580_p10 = por %p579_p8, %p578_p5 }
  0x1b   : > { %p582_p0 = por %p581_p9, %p580_p10 }
  0x1d   : > { %p583_p1 = pnand %p582_p0, %p576_p7 }
  0x1f   : > { %586 = shalt.err (!%p583_p1)
}
  0x20   : > { %s587_s29 = scalar_lea.vmem %s776_s10, 128  ;;  %s670_s30 = smov [#allocation2]  }
  0x21   : > { %p588_p2 = scmp.ne.s32.totalorder %s776_s10, %s587_s29  ;;  %s592_s5 = sshll.u32 %s670_s30, 4  ;;  %s593_s5 = int_to_ptr.vmem [resolvable:$false] %s592_s5 }
  0x22   : > { %s594_s6 = scalar_lea.vmem %s593_s5, 256  ;;  %p595_p11 = scmp.lt.s32.totalorder %s776_s10, %s593_s5 }
  0x23   : > { %p590_p4 = pnand %p588_p2, %p574_p3  ;;  %p596_p5 = scmp.lt.s32.totalorder %s594_s6, %s587_s29 }
  0x25   : > { %p591_p12 = pneg %p590_p4  ;;  %p597_p8 = por %p596_p5, %p595_p11 }
  0x27   : > { %p598_p9 = pnand %p597_p8, %p591_p12 }
  0x29   : > { %601 = shalt.err (!%p598_p9)
}
  0x2a   : > { %522 = dma.hbm_to_vmem [thread:$0]  (!%p772_p13), %s768_s8, 128, %s776_s10, %s163_s12  }
  0x2b   : > { %p890_p0 = scmp.lt.s32.totalorder %s668_s18, 3  ;;  %p891_p1 = scmp.ge.s32.totalorder %s668_s18, 1 }
  0x2d   : > { %p179_p3 = pnand %p891_p1, %p890_p0 }
  0x2e   : > { %s810_s7 = sand.u32 (!%p179_p3), 1, %s660_s16  }
  0x2f   : > { %182 = sbr.rel (%p179_p3) target bundleno = 627 (0x273), region = 36  ;;  %s481_s9 = sshll.u32 (!%p179_p3), %s810_s7, 3 }
  0x30   : > { %s185_s13 = scalar_lea.sflag (!%p179_p3), [#allocation3], %s810_s7  ;;  %s188_s11 = scalar_lea.vmem (!%p179_p3), [#allocation2], %s481_s9 }
  0x36   : > { %647 = dma.done.wait (%p748_p6), %s185_s13, 128  }
  0x37   : > { %649 = vsyncadd (%p748_p6), %s185_s13, 4294967168  ;;  %v671_v0 = vmov 0.0|0.0   ;;  %v672_v1 = vmov 0.0   ;;  %vm673_vm0 = vmmov 0   ;;  %v674_v2 = vmov 0   ;;  %v213_v3 = vld [vmem:[%s188_s11] sm:$0xff] }
  0x38   : > { %511 = vmatprep.subr.bf16.mxu0 %v671_v0  ;;  %506 = vmatprep.subr.mxu1 %v672_v1  ;;  %v229_v4 = vld [vmem:[%s882_s3] sm:$0xff]  ;;  %s675_s12 = smov 2   ;;  %s676_s14 = smov 126   ;;  %v214_v5 = vlaneseq  ;;  %vm677_vm2 = vmmov 1   ;;  %vm235_vm5 = vcmask 195584   ;;  %v678_v11 = vmov 1  }
  0x39   : > { %503 = vmatprep.mubr.msk.f32.mxu0 %vm673_vm0, %v672_v1  ;;  %508 = vmatprep.mubr.msk.f32.mxu1 %vm673_vm0, %v672_v1  ;;  %v228_v10 = vld [vmem:[%s880_s1] sm:$0xff]  ;;  %vm315_vm6 = vcmask 64512   ;;  %s488_s25 = sshll.u32 %s726_s19, 7  ;;  %s212_s29 = scalar_lea.vmem [#allocation5], %s481_s9 }
  0x3a   : > { %569 = vset.pattern.permute.xlu1 %v674_v2  ;;  %217 = vrot.lane.b32.xlu0 %v213_v3, %s675_s12  ;;  %v215_v6 = vand.u32 127, %v214_v5  ;;  %v310_v17 = vld [vmem:[%s881_s2] sm:$0xff]  ;;  %s405_s30 = sshll.u32 %s212_s29, 4  ;;  %s835_s13 = scalar_lea.hbm %s883_s4, %s488_s25  ;;  %s837_s30 = int_to_ptr.vmem [resolvable:$true] %s405_s30 }
  0x3b   : > { %232 = vperm.xlu1 %569, %v229_v4   ;;  %571 = vset.pattern.permute.xlu0 %v678_v11  ;;  %s392_s11 = scalar_lea.sflag [#allocation4], %s810_s7  ;;  %s602_s8 = scalar_lea.vmem %s837_s30, 128 }
  0x3c   : > { %vm216_vm1 = vcmp.ge.s32.totalorder %v215_v6, 2  ;;  %vm222_vm4 = vcmp.lt.s32.totalorder %v215_v6, 126  ;;  %p603_p6 = scmp.ne.s32.totalorder %s837_s30, %s602_s8  ;;  %p892_p11 = scmp.ne.s32.totalorder %s887_s27, 0 }
  0x3d   : > { %vm513_vm3 = vmpackc.low %vm677_vm2, %vm216_vm1  ;;  %s679_s19 = smov [#allocation5]  }
  0x3e   : > { %223 = vrot.lane.b32.xlu0 %v213_v3, %s676_s14  ;;  %p604_p12 = pnand %p603_p6, %p892_p11  ;;  %s606_s9 = sshll.u32 %s679_s19, 4  ;;  %s607_s9 = int_to_ptr.vmem [resolvable:$false] %s606_s9 }
  0x3f   : > { %570 = vset.pattern.permute.xlu1 %v678_v11  ;;  %s608_s10 = scalar_lea.vmem %s607_s9, 256  ;;  %p609_p7 = scmp.lt.s32.totalorder %s837_s30, %s607_s9 }
  0x40   : > { %312 = vperm.xlu1 %570, %v229_v4   ;;  %p605_p13 = pneg %p604_p12  ;;  %p610_p10 = scmp.lt.s32.totalorder %s608_s10, %s602_s8 }
  0x42   : > { %p611_p2 = por %p610_p10, %p609_p7 }
  0x44   : > { %p612_p4 = pnand %p611_p2, %p605_p13 }
  0xac   : > { %v218_v7 = vpop.permute.xlu0 %217 }
  0xad   : > { %v512_v8 = vpack.c.bf16 %v213_v3, %v218_v7 }
  0xaf   : > { %514 = vmatpush3.bf16.msk.msra.mxu0 %vm513_vm3, %v512_v8 }
  0xb0   : > { %501 = vmatprep.subr.mxu0 %v672_v1  ;;  %v224_v9 = vpop.permute.xlu0 %223 }
  0xb3   : > { %502 = vmatpush3.msk.msra.mxu0 %vm222_vm4, %v224_v9 }
  0xb4   : > { %504 = vmatmul.mubr.msk.f32.vlgmr.msra.gmra.mrb[0].mxu0 %vm235_vm5, %v228_v10 }
  0xba   : > { %v233_v12 = vpop.permute.xlu1 %232 }
  0xbf   : > { %v313_v18 = vpop.permute.xlu1 %312 }
 0x187   : > { %v305_v13 = vpop.f32.mrb[0].mxu0 }
 0x188   : > { %v306_v14 = vadd.f32 %v305_v13, %v233_v12  ;;  %v505_v15 = vpop.f32.mrb[1].mxu0 }
 0x18a   : > { %v309_v16 = vmax.f32 %v306_v14, 0.0 }
 0x18c   : > { %507 = vmatpush3.msra.mxu1 %v309_v16 }
 0x18d   : > { %509 = vmatmul.mubr.msk.f32.vlgmr.msra.gmra.mrb[0].mxu1 %vm315_vm6, %v310_v17 }
 0x260   : > { %v385_v19 = vpop.f32.mrb[0].mxu1 }
 0x261   : > { %v386_v20 = vadd.f32 %v385_v19, %v313_v18  ;;  %v510_v21 = vpop.f32.mrb[1].mxu1 }
 0x263   : > { %v389_v22 = vadd.f32 %v386_v20, %v213_v3 }
 0x265   : > { %390 = vst [vmem:[%s212_s29] sm:$0xff] %v389_v22 }
 0x266   : > { %615 = shalt.err (!%p612_p4)
}
 0x267   : > { %s616_s7 = scalar_lea.hbm %s835_s13, 128  ;;  %s620_s26 = scalar_lea.hbm %s883_s4, 256 }
 0x268   : > { %p617_p5 = scmp.ne.s32.totalorder %s835_s13, %s616_s7  ;;  %p621_p0 = scmp.lt.u32.totalorder %s835_s13, %s883_s4 }
 0x269   : > { %p622_p1 = scmp.lt.u32.totalorder %s620_s26, %s616_s7  ;;  %p624_p6 = scmp.lt.u32.totalorder %s616_s7, %s835_s13 }
 0x26a   : > { %p618_p8 = pnand %p617_p5, %p892_p11 }
 0x26b   : > { %p623_p3 = por %p622_p1, %p621_p0 }
 0x26c   : > { %p619_p9 = pneg %p618_p8 }
 0x26d   : > { %p625_p12 = por %p624_p6, %p623_p3 }
 0x26f   : > { %p626_p13 = pnand %p625_p12, %p619_p9 }
 0x271   : > { %629 = shalt.err (!%p626_p13)
}
 0x272   : > { %517 = dma.vmem_to_hbm [thread:$0]  (%p892_p11), %s837_s30, 128, %s835_s13, %s392_s11  }
 0x273 PF: > { %s417_s23 = sand.u32 1, %s656_s15   ;;  %p893_p7 = scmp.ne.s32.totalorder %s888_s28, 0 }
 0x274   : > { %p894_p10 = scmp.ge.s32.totalorder %s668_s18, 2  ;;  %s418_s25 = scalar_lea.sflag [#allocation4], %s417_s23 }
 0x276   : > { %p524_p2 = pnand %p894_p10, %p893_p7 }
 0x278   : > { %651 = dma.done.wait (!%p524_p2), %s418_s25, 128  }
 0x279   : > { %653 = vsyncadd (!%p524_p2), %s418_s25, 4294967168  ;;  %p17_p4 = scmp.ge.s32.totalorder %s730_s21, 4   ;;  %s895_s15 = smov %s660_s16 }
 0x27a   : > { %s896_s16 = smov %s664_s17  ;;  %s897_s17 = smov %s742_s24 }
 0x27b   : > { %s898_s18 = smov %s730_s21  ;;  %19 = sbr.rel (!%p17_p4) target bundleno = 5 (0x5), region = 81 }
 0x282   :  { %423 = vsyncpa [#allocation3], 1 }
 0x283   :  { %425 = vsyncpa [#allocation3 + $0x1], 1 }
 0x284   :  { %426 = vsyncpa [#allocation4], 1 }
 0x285   :  { %428 = vsyncpa [#allocation4 + $0x1], 1 }

</bundles_post_ra>
